<compile_context>
chip_gen: v5e
topology: v5e:2x2
jax: 0.10.0
libtpu: 0.0.40
codegen_flags: <defaults>
</compile_context>

<pallas_src>
import jax
import jax.numpy as jnp
from jax.experimental import pallas as pl
from jax.experimental.pallas import tpu as pltpu


def _round_up(n, m):
    return (n + m - 1) // m * m


def make_fcn_kernel(act="relu"):
    if act == "relu":
        nonlin = lambda h: jnp.maximum(h, 0.0)   # VPU
    elif act == "tanh":
        nonlin = jnp.tanh                        # EUP (own bundle slot)
    else:
        raise ValueError(f"unsupported act: {act}")

    def fcn_kernel(x_ref, w1_ref, b1_ref, w2_ref, b2_ref, o_ref):
        # x_ref : (TB, D_in)  VMEM (streamed per grid step)
        # w1_ref: (D_in, H)   VMEM (resident)      b1_ref: (1, H) VMEM (resident)
        # w2_ref: (1, H)      VMEM (resident)      b2_ref: (1, 1) SMEM scalar
        # o_ref : (TB, 1)
        h = jnp.dot(x_ref[...], w1_ref[...],
                    preferred_element_type=jnp.float32)          # MXU, f32 acc
        h = nonlin(h + b1_ref[...])                              # bias + act (VPU/EUP)
        # Second layer (OUT = 1): VPU multiply + XLU lane reduce instead of a
        # wasteful (H, 1) MXU matmul.
        y = jnp.sum(h * w2_ref[...], axis=-1, keepdims=True) + b2_ref[0, 0]
        o_ref[...] = y.astype(o_ref.dtype)

    return fcn_kernel


def fcn_forward(x, w1, b1, w2, b2, *, tb=512, act="relu", use_bf16=False):
    """Fused FCN forward.

    x : (B, D_in)      w1: (D_in, H)   b1: (1, H)
    w2: (1, H)  (row layout so layer 2 is a VPU mul + lane reduction)
    b2: (1, 1)  (scalar, passed through SMEM)
    Returns a (B,) vector, matching the PyTorch module's `.flatten()`.
    """
    B, d_in = x.shape
    _, hidden = w1.shape
    assert w1.shape == (d_in, hidden)
    assert b1.shape == (1, hidden)
    assert w2.shape == (1, hidden)
    assert b2.shape == (1, 1)

    # Batch tiling: TB rows per grid step (sublane multiple; 16 if bf16-packed).
    row_mult = 16 if use_bf16 else 8
    tb_eff = _round_up(min(tb, _round_up(B, row_mult)), row_mult)
    b_pad = _round_up(B, tb_eff)
    if b_pad != B:
        x = jnp.pad(x, ((0, b_pad - B), (0, 0)))

    if use_bf16:
        # v6e/v7x: halve HBM/VMEM bytes of the dominant x stream; the matmul
        # still accumulates in f32 via preferred_element_type above.
        x = x.astype(jnp.bfloat16)
        w1 = w1.astype(jnp.bfloat16)

    grid = (b_pad // tb_eff,)

    cost = pl.CostEstimate(
        flops=2 * b_pad * hidden * (d_in + 1),
        transcendentals=b_pad * hidden if act == "tanh" else 0,
        bytes_accessed=(x.size * x.dtype.itemsize
                        + w1.size * w1.dtype.itemsize
                        + (b1.size + w2.size + b2.size + b_pad) * 4),
    )

    y = pl.pallas_call(
        make_fcn_kernel(act),
        out_shape=jax.ShapeDtypeStruct((b_pad, 1), jnp.float32),
        grid=grid,
        in_specs=[
            pl.BlockSpec((tb_eff, d_in), lambda i: (i, 0)),      # x: streamed
            pl.BlockSpec((d_in, hidden), lambda i: (0, 0)),      # w1: resident
            pl.BlockSpec((1, hidden), lambda i: (0, 0)),         # b1: resident
            pl.BlockSpec((1, hidden), lambda i: (0, 0)),         # w2: resident
            pl.BlockSpec(memory_space=pltpu.MemorySpace.SMEM),   # b2: SMEM scalar
        ],
        out_specs=pl.BlockSpec((tb_eff, 1), lambda i: (i, 0)),
        compiler_params=pltpu.CompilerParams(
            dimension_semantics=("parallel",),   # v7x: both TCs split the batch
        ),
        cost_estimate=cost,
    )(x, w1, b1, w2, b2)

    # PyTorch: return self.layers[-1](x).flatten()  -> shape (B,)
    return y.reshape(-1)[:B]


def init_fcn_params(key, bits=16, skill_cnt=5, middle=128, out=1, init=0.1):
    """Deterministic normal(std=init) init, mirroring torch.nn.init.normal_.

    Stored in kernel-friendly layouts: w1 (D_in, H), b1 (1, H), w2 (1, H),
    b2 (1, 1).  (out is fixed to 1 as in the module's default.)
    """
    assert out == 1
    d_in = bits + skill_cnt
    k1, k2, k3, k4 = jax.random.split(key, 4)
    w1 = jax.random.normal(k1, (d_in, middle), dtype=jnp.float32) * init
    b1 = jax.random.normal(k2, (1, middle), dtype=jnp.float32) * init
    w2 = jax.random.normal(k3, (1, middle), dtype=jnp.float32) * init
    b2 = jax.random.normal(k4, (1, 1), dtype=jnp.float32) * init
    return w1, b1, w2, b2


if __name__ == "__main__":
    # Small shapes consistent with the module: bits=16, skill_cnt=5 -> D_in=21;
    # hidden=128; out=1.  Batch=256 with TB=128 so the batch grid (2 "parallel"
    # steps) is actually exercised while staying tiny.
    bits, skill_cnt, middle = 16, 5, 128
    d_in = bits + skill_cnt
    B, TB = 256, 128

    key = jax.random.PRNGKey(0)
    kx, kp = jax.random.split(key)
    x = jax.random.normal(kx, (B, d_in), dtype=jnp.float32)
    w1, b1, w2, b2 = init_fcn_params(kp, bits, skill_cnt, middle, out=1, init=0.1)

    y = fcn_forward(x, w1, b1, w2, b2, tb=TB)   # f32 path (use_bf16=True for v6e/v7x)
    jax.block_until_ready(y)

    # Pure-JAX reference of the same math (Linear -> ReLU -> Linear -> flatten).
    h_ref = jnp.maximum(
        jnp.dot(x, w1, precision=jax.lax.Precision.HIGHEST) + b1, 0.0)
    y_ref = (jnp.dot(h_ref, w2.T, precision=jax.lax.Precision.HIGHEST)
             + b2[0, 0]).reshape(-1)

    assert y.shape == (B,)
    # Loose-ish tolerance: kernel MXU f32 path vs HIGHEST-precision reference.
    assert jnp.allclose(y, y_ref, atol=2e-3, rtol=2e-2), \
        float(jnp.max(jnp.abs(y - y_ref)))

    print("KERNEL_OK")
</pallas_src>

<mosaic_0001>
module attributes {stable_mosaic.version = 11 : i64} {
  func.func @fcn_kernel(%arg0: i32, %arg1: memref<128x21xf32, #tpu.memory_space<vmem>>, %arg2: memref<21x128xf32, #tpu.memory_space<vmem>>, %arg3: memref<1x128xf32, #tpu.memory_space<vmem>>, %arg4: memref<1x128xf32, #tpu.memory_space<vmem>>, %arg5: memref<1x1xf32, #tpu.memory_space<smem>>, %arg6: memref<128x1xf32, #tpu.memory_space<vmem>>) attributes {dimension_semantics = [#tpu.dimension_semantics<parallel>], iteration_bounds = array<i64: 2>, scalar_prefetch = 0 : i64, scratch_operands = 0 : i64, tpu.core_type = #tpu.core_type<tc>, window_params = [{transform_indices = @transform_0, window_bounds = array<i64: 128, 21>}, {pipeline_mode = #tpu.pipeline_mode<synchronous>, transform_indices = @transform_1, window_bounds = array<i64: 21, 128>}, {pipeline_mode = #tpu.pipeline_mode<synchronous>, transform_indices = @transform_2, window_bounds = array<i64: 1, 128>}, {pipeline_mode = #tpu.pipeline_mode<synchronous>, transform_indices = @transform_3, window_bounds = array<i64: 1, 128>}, {transform_indices = @transform_4, window_bounds = array<i64: 1, 1>}, {transform_indices = @transform_5, window_bounds = array<i64: 128, 1>}]} {
    %c0 = arith.constant 0 : index
    %c0_0 = arith.constant 0 : index
    %0 = vector.load %arg1[%c0, %c0_0] : memref<128x21xf32, #tpu.memory_space<vmem>>, vector<128x21xf32>
    %c0_1 = arith.constant 0 : index
    %c0_2 = arith.constant 0 : index
    %1 = vector.load %arg2[%c0_1, %c0_2] : memref<21x128xf32, #tpu.memory_space<vmem>>, vector<21x128xf32>
    %cst = arith.constant dense<0.000000e+00> : vector<128x128xf32>
    %2 = tpu.matmul %0, %1, %cst {dimension_numbers = #tpu.dot_dimension_numbers<[1], [0], [0], [1], [0, 0, 1, 1], [], []>} : vector<128x21xf32>, vector<21x128xf32>, vector<128x128xf32> -> vector<128x128xf32>
    %c0_3 = arith.constant 0 : index
    %c0_4 = arith.constant 0 : index
    %3 = vector.load %arg3[%c0_3, %c0_4] : memref<1x128xf32, #tpu.memory_space<vmem>>, vector<1x128xf32>
    %4 = vector.broadcast %3 : vector<1x128xf32> to vector<128x128xf32>
    %5 = arith.addf %2, %4 : vector<128x128xf32>
    %cst_5 = arith.constant 0.000000e+00 : f32
    %6 = vector.broadcast %cst_5 : f32 to vector<128x128xf32>
    %7 = arith.maximumf %5, %6 : vector<128x128xf32>
    %c0_6 = arith.constant 0 : index
    %c0_7 = arith.constant 0 : index
    %8 = vector.load %arg4[%c0_6, %c0_7] : memref<1x128xf32, #tpu.memory_space<vmem>>, vector<1x128xf32>
    %9 = vector.broadcast %8 : vector<1x128xf32> to vector<128x128xf32>
    %10 = arith.mulf %7, %9 : vector<128x128xf32>
    %cst_8 = arith.constant dense<0.000000e+00> : vector<128xf32>
    %11 = vector.multi_reduction <add>, %10, %cst_8 [1] : vector<128x128xf32> to vector<128xf32>
    %12 = vector.shape_cast %11 : vector<128xf32> to vector<128x1xf32>
    %c0_9 = arith.constant 0 : index
    %c0_10 = arith.constant 0 : index
    %13 = memref.load %arg5[%c0_9, %c0_10] : memref<1x1xf32, #tpu.memory_space<smem>>
    %14 = vector.broadcast %13 : f32 to vector<128x1xf32>
    %15 = arith.addf %12, %14 : vector<128x1xf32>
    %c0_11 = arith.constant 0 : index
    %c0_12 = arith.constant 0 : index
    %16 = vector.load %arg6[%c0_11, %c0_12] : memref<128x1xf32, #tpu.memory_space<vmem>>, vector<128x1xf32>
    tpu.vector_store %arg6[%c0_11, %c0_12], %15 {strides = array<i32>} : memref<128x1xf32, #tpu.memory_space<vmem>>, vector<128x1xf32>,
    return
  }
  func.func @transform_0(%arg0: i32) -> (i32, i32) {
    %c0_i32 = arith.constant 0 : i32
    %c0_i32_0 = arith.constant 0 : i32
    return %arg0, %c0_i32 : i32, i32
  }
  func.func @transform_1(%arg0: i32) -> (i32, i32) {
    %c0_i32 = arith.constant 0 : i32
    %c0_i32_0 = arith.constant 0 : i32
    %c0_i32_1 = arith.constant 0 : i32
    return %c0_i32, %c0_i32_0 : i32, i32
  }
  func.func @transform_2(%arg0: i32) -> (i32, i32) {
    %c0_i32 = arith.constant 0 : i32
    %c0_i32_0 = arith.constant 0 : i32
    %c0_i32_1 = arith.constant 0 : i32
    return %c0_i32, %c0_i32_0 : i32, i32
  }
  func.func @transform_3(%arg0: i32) -> (i32, i32) {
    %c0_i32 = arith.constant 0 : i32
    %c0_i32_0 = arith.constant 0 : i32
    %c0_i32_1 = arith.constant 0 : i32
    return %c0_i32, %c0_i32_0 : i32, i32
  }
  func.func @transform_4(%arg0: i32) -> (i32, i32) {
    %c0_i32 = arith.constant 0 : i32
    %c0_i32_0 = arith.constant 0 : i32
    %c0_i32_1 = arith.constant 0 : i32
    return %c0_i32, %c0_i32_0 : i32, i32
  }
  func.func @transform_5(%arg0: i32) -> (i32, i32) {
    %c0_i32 = arith.constant 0 : i32
    %c0_i32_0 = arith.constant 0 : i32
    return %arg0, %c0_i32 : i32, i32
  }
}

</mosaic_0001>

<bundles_post_ra>
// kernel: tpu_custom_call.1
= control target key start
LH: loop header
LB: loop body
LE: loop exit
PB: predicated region body
PF: predicated region fallthrough
CT: control target
= control target key end

     0   :  { %s617_s20 = smov 0   ;;  %s742_s0 = inlined_call_operand.vmem [shape: f32[256,21], index: 0, kind: input, shape index: {}]   ;;  %s743_s1 = inlined_call_operand.vmem [shape: f32[21,128], index: 1, kind: input, shape index: {}]   ;;  %s744_s2 = inlined_call_operand.vmem [shape: f32[1,128], index: 2, kind: input, shape index: {}]   ;;  %s745_s3 = inlined_call_operand.vmem [shape: f32[1,128], index: 3, kind: input, shape index: {}]   ;;  %s746_s4 = inlined_call_operand.<no memory space> [shape: f32[1,1], index: 4, kind: input, shape index: {}]   ;;  %s747_s5 = inlined_call_operand.vmem [shape: f32[256,1], index: 5, kind: output, shape index: {}]  }
   0x1   :  { %10 = sst [smem:[#allocation2]] %s746_s4 }
   0x2 LB: > { %s529_s21 = sadd.s32 4294967295, %s582_s20   ;;  %p533_p0 = scmp.ge.s32.totalorder %s582_s20, 1  ;;  %s582_s20 = sphi %s617_s20, %s16_s20  }
   0x3   : > { %p189_p1 = scmp.lt.s32.totalorder %s582_s20, 3 }
   0x5   : > { %p190_p2 = pnand %p533_p0, %p189_p1 }
   0x6   : > { %s534_s25 = sshll.u32 (!%p190_p2), %s529_s21, 4  ;;  %s438_s11 = sld [smem:[#allocation2]] (!%p190_p2) }
   0x7   : > { %193 = sbr.rel (%p190_p2) target bundleno = 318 (0x13e), region = 40  ;;  %p218_p3 = scmp.lt.s32.totalorder (!%p190_p2), %s534_s25, 31 }
   0xc   : > { %v247_v0 = vld [vmem:[%s743_s1 + $0x10] sm:$0x1f]  ;;  %vm301_vm0 = vcmask 1044480   ;;  %v246_v1 = vld [vmem:[%s743_s1 + $0x8] sm:$0xff]  ;;  %v245_v2 = vld [vmem:[%s743_s1] sm:$0xff]  ;;  %s749_s25 = smov (!%p218_p3, %s534_s25), 31 }
   0xd   : > { %538 = vmatpush.msk.msra.mxu0 %vm301_vm0, %v247_v0  ;;  %557 = vmatpush.msk.msra.mxu1 %vm301_vm0, %v247_v0  ;;  %s535_s28 = sshll.u32 %s749_s25, 3  ;;  %vm252_vm1 = vcmask 171008   ;;  %v661_v19 = vld [vmem:[%s744_s2] ss:$0 sm:$0xff]  ;;  %vm456_vm2 = vcmask 7168  }
   0xe   : > { %558 = vmatpush.msk.msra.mxu2 %vm301_vm0, %v247_v0  ;;  %559 = vmatpush.msk.msra.mxu3 %vm301_vm0, %v247_v0  ;;  %s221_s6 = scalar_lea.vmem %s742_s0, %s535_s28  ;;  %v668_v24 = vld [vmem:[%s745_s3] ss:$0 sm:$0xff]  ;;  %s705_s14 = scalar_lea.vmem %s747_s5, %s535_s28 }
   0xf   : > { %319 = vmatpush.msra.mxu0 %v246_v1  ;;  %560 = vmatpush.msra.mxu1 %v246_v1  ;;  %v229_v3 = vld [vmem:[%s221_s6] sm:$0xff]  ;;  %v230_v7 = vld [vmem:[%s221_s6 + $0x8] sm:$0xff]  ;;  %v231_v11 = vld [vmem:[%s221_s6 + $0x10] sm:$0xff] }
  0x10   : > { %561 = vmatpush.msra.mxu2 %v246_v1  ;;  %562 = vmatpush.msra.mxu3 %v246_v1  ;;  %v233_v4 = vld [vmem:[%s221_s6 + $0x20] sm:$0xff]  ;;  %v234_v8 = vld [vmem:[%s221_s6 + $0x28] sm:$0xff]  ;;  %v235_v12 = vld [vmem:[%s221_s6 + $0x30] sm:$0xff] }
  0x11   : > { %320 = vmatpush.msra.mxu0 %v245_v2  ;;  %563 = vmatpush.msra.mxu1 %v245_v2  ;;  %v237_v5 = vld [vmem:[%s221_s6 + $0x40] sm:$0xff]  ;;  %v238_v9 = vld [vmem:[%s221_s6 + $0x48] sm:$0xff]  ;;  %v239_v13 = vld [vmem:[%s221_s6 + $0x50] sm:$0xff] }
  0x12   : > { %564 = vmatpush.msra.mxu2 %v245_v2  ;;  %565 = vmatpush.msra.mxu3 %v245_v2  ;;  %v241_v6 = vld [vmem:[%s221_s6 + $0x60] sm:$0xff]  ;;  %v242_v10 = vld [vmem:[%s221_s6 + $0x68] sm:$0xff]  ;;  %v243_v14 = vld [vmem:[%s221_s6 + $0x70] sm:$0xff] }
  0x13   : > { %539 = vmatmul.msk.f32.vlgmr.msra.gmra.mxu0 %vm252_vm1, %v229_v3  ;;  %543 = vmatmul.msk.f32.vlgmr.msra.gmra.mxu1 %vm252_vm1, %v233_v4  ;;  %v232_v15 = vld [vmem:[%s221_s6 + $0x18] sm:$0xff] }
  0x14   : > { %547 = vmatmul.msk.f32.vlgmr.msra.gmra.mxu2 %vm252_vm1, %v237_v5  ;;  %551 = vmatmul.msk.f32.vlgmr.msra.gmra.mxu3 %vm252_vm1, %v241_v6  ;;  %v236_v16 = vld [vmem:[%s221_s6 + $0x38] sm:$0xff] }
  0x15   : > { %v240_v17 = vld [vmem:[%s221_s6 + $0x58] sm:$0xff] }
  0x16   : > { %v244_v18 = vld [vmem:[%s221_s6 + $0x78] sm:$0xff] }
  0x1b   : > { %540 = vmatmul.msk.f32.gmra.mxu0 %vm252_vm1, %v230_v7  ;;  %544 = vmatmul.msk.f32.gmra.mxu1 %vm252_vm1, %v234_v8 }
  0x1c   : > { %548 = vmatmul.msk.f32.gmra.mxu2 %vm252_vm1, %v238_v9  ;;  %552 = vmatmul.msk.f32.gmra.mxu3 %vm252_vm1, %v242_v10 }
  0x23   : > { %541 = vmatmul.msk.f32.gmra.mxu0 %vm252_vm1, %v231_v11  ;;  %545 = vmatmul.msk.f32.gmra.mxu1 %vm252_vm1, %v235_v12 }
  0x24   : > { %549 = vmatmul.msk.f32.gmra.mxu2 %vm252_vm1, %v239_v13  ;;  %553 = vmatmul.msk.f32.gmra.mxu3 %vm252_vm1, %v243_v14 }
  0x2b   : > { %542 = vmatmul.msk.f32.gmra.mxu0 %vm252_vm1, %v232_v15  ;;  %546 = vmatmul.msk.f32.gmra.mxu1 %vm252_vm1, %v236_v16 }
  0x2c   : > { %550 = vmatmul.msk.f32.gmra.mxu2 %vm252_vm1, %v240_v17  ;;  %554 = vmatmul.msk.f32.gmra.mxu3 %vm252_vm1, %v244_v18 }
  0x90   : > { %v322_v20 = vpop.f32.mrf.mxu0  ;;  %v334_v21 = vpop.f32.mrf.mxu1 }
  0x91   : > { %v323_v22 = vadd.f32 %v661_v19, %v322_v20  ;;  %v335_v23 = vadd.f32 %v661_v19, %v334_v21 }
  0x93   : > { %v370_v25 = vmax.f32 %v323_v22, 0.0  ;;  %v374_v26 = vmax.f32 %v335_v23, 0.0  ;;  %v439_v22 = vstv %s438_s11 }
  0x95   : > { %v394_v27 = vmul.f32 %v668_v24, %v374_v26  ;;  %v390_v28 = vmul.f32 %v668_v24, %v370_v25 }
  0x97   : > { %414 = vadd.xlane.f32.xlu2 %v394_v27  ;;  %406 = vadd.xlane.f32.xlu0 %v390_v28  ;;  %v346_v29 = vpop.f32.mrf.mxu2  ;;  %v358_v30 = vpop.f32.mrf.mxu3 }
  0x98   : > { %v325_v31 = vpop.f32.mrf.mxu0  ;;  %v347_v32 = vadd.f32 %v661_v19, %v346_v29  ;;  %v359_v33 = vadd.f32 %v661_v19, %v358_v30  ;;  %v337_v34 = vpop.f32.mrf.mxu1 }
  0x99   : > { %v338_v39 = vadd.f32 %v661_v19, %v337_v34  ;;  %v326_v40 = vadd.f32 %v661_v19, %v325_v31 }
  0x9a   : > { %v378_v35 = vmax.f32 %v347_v32, 0.0  ;;  %v382_v36 = vmax.f32 %v359_v33, 0.0 }
  0x9b   : > { %v375_v44 = vmax.f32 %v338_v39, 0.0  ;;  %v371_v45 = vmax.f32 %v326_v40, 0.0 }
  0x9c   : > { %v398_v37 = vmul.f32 %v668_v24, %v378_v35  ;;  %v402_v38 = vmul.f32 %v668_v24, %v382_v36 }
  0x9d   : > { %v395_v48 = vmul.f32 %v668_v24, %v375_v44  ;;  %v391_v51 = vmul.f32 %v668_v24, %v371_v45 }
  0x9f   : > { %422 = vadd.xlane.f32.xlu2 %v398_v37  ;;  %430 = vadd.xlane.f32.xlu0 %v402_v38  ;;  %v349_v41 = vpop.f32.mrf.mxu2  ;;  %v361_v42 = vpop.f32.mrf.mxu3 }
  0xa0   : > { %v328_v43 = vpop.f32.mrf.mxu0  ;;  %v350_v49 = vadd.f32 %v661_v19, %v349_v41  ;;  %v340_v52 = vpop.f32.mrf.mxu1  ;;  %v362_v18 = vadd.f32 %v661_v19, %v361_v42 }
  0xa1   : > { %v329_v46 = vadd.f32 %v661_v19, %v328_v43  ;;  %v341_v60 = vadd.f32 %v661_v19, %v340_v52 }
  0xa2   : > { %v379_v57 = vmax.f32 %v350_v49, 0.0  ;;  %v383_v20 = vmax.f32 %v362_v18, 0.0 }
  0xa3   : > { %v372_v47 = vmax.f32 %v329_v46, 0.0  ;;  %v376_v0 = vmax.f32 %v341_v60, 0.0 }
  0xa4   : > { %v399_v62 = vmul.f32 %v668_v24, %v379_v57  ;;  %v403_v21 = vmul.f32 %v668_v24, %v383_v20 }
  0xa5   : > { %v392_v50 = vmul.f32 %v668_v24, %v372_v47  ;;  %v396_v8 = vmul.f32 %v668_v24, %v376_v0 }
  0xa7   : > { %410 = vadd.xlane.f32.xlu1 %v392_v50  ;;  %408 = vadd.xlane.f32.xlu0 %v391_v51  ;;  %v352_v53 = vpop.f32.mrf.mxu2  ;;  %v364_v54 = vpop.f32.mrf.mxu3 }
  0xa8   : > { %v353_v55 = vadd.f32 %v661_v19, %v352_v53  ;;  %416 = vadd.xlane.f32.xlu2 %v395_v48  ;;  %v331_v56 = vpop.f32.mrf.mxu0  ;;  %v343_v3 = vpop.f32.mrf.mxu1  ;;  %v365_v6 = vadd.f32 %v661_v19, %v364_v54 }
  0xa9   : > { %v332_v59 = vadd.f32 %v661_v19, %v331_v56  ;;  %v344_v9 = vadd.f32 %v661_v19, %v343_v3 }
  0xaa   : > { %v380_v58 = vmax.f32 %v353_v55, 0.0  ;;  %v384_v12 = vmax.f32 %v365_v6, 0.0 }
  0xab   : > { %v373_v63 = vmax.f32 %v332_v59, 0.0  ;;  %v377_v13 = vmax.f32 %v344_v9, 0.0 }
  0xac   : > { %v400_v61 = vmul.f32 %v668_v24, %v380_v58  ;;  %v404_v15 = vmul.f32 %v668_v24, %v384_v12 }
  0xad   : > { %v393_v7 = vmul.f32 %v668_v24, %v373_v63  ;;  %v397_v16 = vmul.f32 %v668_v24, %v377_v13 }
  0xaf   : > { %426 = vadd.xlane.f32.xlu1 %v400_v61  ;;  %424 = vadd.xlane.f32.xlu0 %v399_v62  ;;  %v355_v1 = vpop.f32.mrf.mxu2  ;;  %v367_v4 = vpop.f32.mrf.mxu3 }
  0xb0   : > { %v356_v2 = vadd.f32 %v661_v19, %v355_v1  ;;  %v368_v10 = vadd.f32 %v661_v19, %v367_v4 }
  0xb2   : > { %v381_v5 = vmax.f32 %v356_v2, 0.0  ;;  %v385_v14 = vmax.f32 %v368_v10, 0.0 }
  0xb4   : > { %v401_v11 = vmul.f32 %v668_v24, %v381_v5  ;;  %v405_v17 = vmul.f32 %v668_v24, %v385_v14 }
  0xb6   : > { %428 = vadd.xlane.f32.xlu2 %v401_v11 }
  0xb7   : > { %412 = vadd.xlane.f32.xlu1 %v393_v7  ;;  %418 = vadd.xlane.f32.xlu0 %v396_v8 }
  0xbe   : > { %434 = vadd.xlane.f32.xlu2 %v404_v15 }
  0xbf   : > { %420 = vadd.xlane.f32.xlu1 %v397_v16  ;;  %436 = vadd.xlane.f32.xlu0 %v405_v17 }
  0xc7   : > { %432 = vadd.xlane.f32.xlu1 %v403_v21 }
 0x10a   : > { %v415_v23 = vpop.xlane.xlu2 %414  ;;  %v407_v25 = vpop.xlane.xlu0 %406 }
 0x10b   : > { %v444_v19 = vadd.f32 %v439_v22, %v415_v23  ;;  %v440_v26 = vadd.f32 %v439_v22, %v407_v25 }
 0x10d   : > { %461 = vst.msk [vmem:[%s705_s14 + $0x20] sm:$0xff] %vm456_vm2, %v444_v19 }
 0x10e   : > { %457 = vst.msk [vmem:[%s705_s14] sm:$0xff] %vm456_vm2, %v440_v26 }
 0x112   : > { %v423_v24 = vpop.xlane.xlu2 %422  ;;  %v431_v27 = vpop.xlane.xlu0 %430 }
 0x113   : > { %v448_v28 = vadd.f32 %v439_v22, %v423_v24  ;;  %v452_v29 = vadd.f32 %v439_v22, %v431_v27 }
 0x115   : > { %465 = vst.msk [vmem:[%s705_s14 + $0x40] sm:$0xff] %vm456_vm2, %v448_v28 }
 0x116   : > { %469 = vst.msk [vmem:[%s705_s14 + $0x60] sm:$0xff] %vm456_vm2, %v452_v29 }
 0x11a   : > { %v411_v30 = vpop.xlane.xlu1 %410  ;;  %v409_v31 = vpop.xlane.xlu0 %408 }
 0x11b   : > { %v442_v32 = vadd.f32 %v439_v22, %v411_v30  ;;  %v441_v33 = vadd.f32 %v439_v22, %v409_v31  ;;  %v417_v34 = vpop.xlane.xlu2 %416 }
 0x11c   : > { %v445_v35 = vadd.f32 %v439_v22, %v417_v34 }
 0x11d   : > { %459 = vst.msk [vmem:[%s705_s14 + $0x10] sm:$0xff] %vm456_vm2, %v442_v32 }
 0x11e   : > { %458 = vst.msk [vmem:[%s705_s14 + $0x8] sm:$0xff] %vm456_vm2, %v441_v33 }
 0x11f   : > { %462 = vst.msk [vmem:[%s705_s14 + $0x28] sm:$0xff] %vm456_vm2, %v445_v35 }
 0x122   : > { %v427_v36 = vpop.xlane.xlu1 %426  ;;  %v425_v37 = vpop.xlane.xlu0 %424 }
 0x123   : > { %v450_v38 = vadd.f32 %v439_v22, %v427_v36  ;;  %v449_v39 = vadd.f32 %v439_v22, %v425_v37 }
 0x125   : > { %467 = vst.msk [vmem:[%s705_s14 + $0x50] sm:$0xff] %vm456_vm2, %v450_v38 }
 0x126   : > { %466 = vst.msk [vmem:[%s705_s14 + $0x48] sm:$0xff] %vm456_vm2, %v449_v39 }
 0x129   : > { %v429_v40 = vpop.xlane.xlu2 %428 }
 0x12a   : > { %v451_v41 = vadd.f32 %v439_v22, %v429_v40  ;;  %v413_v42 = vpop.xlane.xlu1 %412  ;;  %v419_v43 = vpop.xlane.xlu0 %418 }
 0x12b   : > { %v443_v44 = vadd.f32 %v439_v22, %v413_v42  ;;  %v446_v45 = vadd.f32 %v439_v22, %v419_v43 }
 0x12c   : > { %468 = vst.msk [vmem:[%s705_s14 + $0x58] sm:$0xff] %vm456_vm2, %v451_v41 }
 0x12d   : > { %460 = vst.msk [vmem:[%s705_s14 + $0x18] sm:$0xff] %vm456_vm2, %v443_v44 }
 0x12e   : > { %463 = vst.msk [vmem:[%s705_s14 + $0x30] sm:$0xff] %vm456_vm2, %v446_v45 }
 0x131   : > { %v435_v46 = vpop.xlane.xlu2 %434 }
 0x132   : > { %v454_v47 = vadd.f32 %v439_v22, %v435_v46  ;;  %v421_v48 = vpop.xlane.xlu1 %420  ;;  %v437_v49 = vpop.xlane.xlu0 %436 }
 0x133   : > { %v447_v50 = vadd.f32 %v439_v22, %v421_v48  ;;  %v455_v51 = vadd.f32 %v439_v22, %v437_v49 }
 0x134   : > { %471 = vst.msk [vmem:[%s705_s14 + $0x70] sm:$0xff] %vm456_vm2, %v454_v47 }
 0x135   : > { %464 = vst.msk [vmem:[%s705_s14 + $0x38] sm:$0xff] %vm456_vm2, %v447_v50 }
 0x136   : > { %472 = vst.msk [vmem:[%s705_s14 + $0x78] sm:$0xff] %vm456_vm2, %v455_v51 }
 0x13a   : > { %v433_v52 = vpop.xlane.xlu1 %432 }
 0x13b   : > { %v453_v53 = vadd.f32 %v439_v22, %v433_v52 }
 0x13d   : > { %470 = vst.msk [vmem:[%s705_s14 + $0x68] sm:$0xff] %vm456_vm2, %v453_v53 }
 0x13e PF: > { %s16_s20 = sadd.s32 1, %s582_s20  }
 0x13f   : > { %p13_p4 = scmp.ge.s32.totalorder %s16_s20, 4  }
 0x141   :  { %15 = sbr.rel (!%p13_p4) target bundleno = 2 (0x2), region = 70 }

</bundles_post_ra>
